<compile_context>
chip_gen: v7x
topology: tpu7x:2x2x1
jax: 0.10.0
libtpu: 0.0.40
codegen_flags: <defaults>
</compile_context>

<pallas_src>
import functools

import numpy as np
import jax
import jax.numpy as jnp
from jax import lax
from jax.experimental import pallas as pl
from jax.experimental.pallas import tpu as pltpu


# ---------------------------------------------------------------------------
# Kernel: accumulate the (unnormalized) gram-matrix difference
#   A[b] = sum_n x1[b,:,n] x1[b,:,n]^T - x2[b,:,n] x2[b,:,n]^T
# over lane tiles of the flattened spatial axis.  The (1,1,C,C) output block
# itself is the resident accumulator (same block index across the k axis).
# ---------------------------------------------------------------------------
def _style_gram_kernel(x1_ref, x2_ref, out_ref, *, n_total, kt_per_split,
                       needs_mask):
    s = pl.program_id(1)            # reduction split (parallel across cores)
    k = pl.program_id(2)            # lane-tile step within the split (reduction)

    @pl.when(k == 0)
    def _():
        out_ref[...] = jnp.zeros_like(out_ref)

    f1 = x1_ref[0]                  # (C, TN), native dtype -> MXU directly
    f2 = x2_ref[0]
    tn = f1.shape[-1]
    # Contract the lane axis of both operands: A @ A^T without an explicit
    # transpose (MXU transposed-weight push).
    dn = (((1,), (1,)), ((), ()))

    def _acc(a, b):
        g1 = lax.dot_general(a, a, dn, preferred_element_type=jnp.float32)
        g2 = lax.dot_general(b, b, dn, preferred_element_type=jnp.float32)
        out_ref[0, 0] += g1 - g2

    if not needs_mask:
        # N divides evenly into the launched tiles: pure MXU + DMA steps.
        _acc(f1, f2)
    else:
        # Gate the masking behind a scalar branch so full interior steps pay
        # zero iota/select cost (review item 1).
        n_start = (s * kt_per_split + k) * tn
        is_full = (n_start + tn) <= n_total

        @pl.when(is_full)
        def _():
            _acc(f1, f2)

        @pl.when(jnp.logical_not(is_full))
        def _():
            lane = lax.broadcasted_iota(jnp.int32, (1, tn), 1)
            valid = lane < (n_total - n_start)   # <= 0 for fully-OOB steps

            def _mask(v):
                # select (not multiply) so unspecified padding never propagates
                return jnp.where(valid, v, jnp.zeros((), dtype=v.dtype))

            _acc(_mask(f1), _mask(f2))


# ---------------------------------------------------------------------------
# Generation-aware tiling.
# ---------------------------------------------------------------------------
def _vmem_capacity_bytes():
    """Best-effort per-core VMEM capacity; conservative fallback (64 MiB)."""
    try:
        cap = getattr(pltpu.get_tpu_info(), "vmem_capacity_bytes", None)
        if cap:
            return int(cap)
    except Exception:
        pass
    return 64 * 1024 * 1024


def _pick_tiling(C, N, itemsize):
    """Lane-tile width + vmem limit sized from the chip generation.

    The double-buffered input tiles (2 inputs x 2 pipeline buffers) get roughly
    half of physical VMEM so DMAs stay long and the ~0.35us/step grid overhead
    is amortized; the rest is headroom for the compiler."""
    cap = _vmem_capacity_bytes()
    if cap >= 100 * 1024 * 1024:                 # v5e / v6e: 128 MiB per core
        in_budget, vmem_limit = 48 * 1024 * 1024, 96 * 1024 * 1024
    else:                                        # v7x (or unknown): 64 MiB
        in_budget, vmem_limit = 32 * 1024 * 1024, 48 * 1024 * 1024
    lane = 128
    n_up = -(-N // lane) * lane
    per_col = 2 * 2 * C * itemsize               # bytes per lane column, all bufs
    tn = (in_budget // max(per_col, 1)) // lane * lane
    tn = max(lane, min(tn, n_up))                # no artificial upper cap
    return int(tn), int(vmem_limit)


# ---------------------------------------------------------------------------
# pallas_call wrapper: per-batch unnormalized gram differences (B, C, C).
# ---------------------------------------------------------------------------
def _gram_diff(x1, x2, tile_n=None):
    B, C, N = (int(d) for d in x1.shape)
    itemsize = max(jnp.dtype(x1.dtype).itemsize, jnp.dtype(x2.dtype).itemsize)
    TN, vmem_limit = _pick_tiling(C, N, itemsize)
    if tile_n is not None:                       # test / override hook
        TN = max(128, min(TN, (int(tile_n) // 128) * 128))

    KT = -(-N // TN)                             # total lane tiles
    # v7x megacore: guarantee >= 2 balanced parallel units when the batch axis
    # alone cannot (review item 6).  Harmless on single-TensorCore chips.
    NS = 2 if (B % 2 == 1 and KT >= 2) else 1
    KT2 = -(-KT // NS)                           # tiles per split
    needs_mask = (NS * KT2 * TN) != N

    def in_index_map(b, s, k):
        # The last step of the last split may point one tile past the end when
        # KT is odd; clamp onto the last real tile (its contribution is masked
        # to zero in-kernel).
        return (b, 0, jnp.minimum(s * KT2 + k, KT - 1))

    kernel = functools.partial(_style_gram_kernel, n_total=N,
                               kt_per_split=KT2, needs_mask=needs_mask)

    out = pl.pallas_call(
        kernel,
        out_shape=jax.ShapeDtypeStruct((B, NS, C, C), jnp.float32),
        grid_spec=pltpu.PrefetchScalarGridSpec(
            num_scalar_prefetch=0,
            grid=(B, NS, KT2),
            in_specs=[
                pl.BlockSpec((1, C, TN), in_index_map),
                pl.BlockSpec((1, C, TN), in_index_map),
            ],
            out_specs=pl.BlockSpec((1, 1, C, C), lambda b, s, k: (b, s, 0, 0)),
        ),
        compiler_params=pltpu.CompilerParams(
            dimension_semantics=("parallel", "parallel", "arbitrary"),
            vmem_limit_bytes=vmem_limit,
        ),
    )(x1, x2)
    return jnp.sum(out, axis=1)                  # (B, C, C), sum over splits


# ---------------------------------------------------------------------------
# Differentiable per-pair loss (custom VJP; style_2 is detached).
# ---------------------------------------------------------------------------
@functools.partial(jax.custom_vjp, nondiff_argnums=(2, 3))
def _pair_loss_flat(x1, x2, norm_sq, tile_n):
    loss, _ = _pair_loss_flat_fwd(x1, x2, norm_sq, tile_n)
    return loss


def _pair_loss_flat_fwd(x1, x2, norm_sq, tile_n):
    x2 = lax.stop_gradient(x2)                   # matches Style_2.detach()
    A = _gram_diff(x1, x2, tile_n)               # (B, C, C) f32, unnormalized
    C = x1.shape[1]
    scale = (1.0 / norm_sq) ** 2 / (4.0 * C)     # gram uses features / norm
    loss = jnp.sum(jnp.square(A)) * jnp.float32(scale)
    return loss, (x1, A, jnp.zeros((), x2.dtype))


def _pair_loss_flat_bwd(norm_sq, tile_n, res, ct):
    # dL/dx1 = (G1 - G2) @ (x1/norm) / (C*norm) = A @ x1 / (C * norm_sq^2)
    x1, A, z2 = res
    C = x1.shape[1]
    coef = ct * jnp.float32(1.0 / (C * norm_sq * norm_sq))
    g = jnp.einsum("bij,bjn->bin", A, x1.astype(jnp.float32)) * coef
    dx1 = g.astype(x1.dtype)
    dx2 = jnp.zeros(x1.shape, z2.dtype)          # detached input
    return dx1, dx2


_pair_loss_flat.defvjp(_pair_loss_flat_fwd, _pair_loss_flat_bwd)


def _cal_loss(s1, s2, compute_dtype=None, tile_n=None):
    """Pallas equivalent of Style_loss.cal_loss for one (B, C, *spatial) pair."""
    assert s1.shape == s2.shape and s1.ndim >= 4
    B, C = int(s1.shape[0]), int(s1.shape[1])
    norm_sq = float(np.prod(s1.shape[-3:]))      # norm = sqrt(prod(shape[-3:]))
    N = int(np.prod(s1.shape[2:]))
    x1 = jnp.reshape(s1, (B, C, N))
    x2 = jnp.reshape(lax.stop_gradient(s2), (B, C, N))
    if compute_dtype is not None:
        # Optional bf16 feed (review item 3): halves HBM bytes; slight numeric
        # shift vs. the f32 module, so opt-in only.
        x1 = x1.astype(compute_dtype)
        x2 = x2.astype(compute_dtype)
    return _pair_loss_flat(x1, x2, norm_sq, tile_n)


_GROUP_BYTES_LIMIT = 32 * 1024 * 1024   # only stack small maps (concat = HBM copy)


def style_loss(style_1, style_2, compute_dtype=None):
    """Pallas port of Style_loss.forward (handles list or single-tensor inputs)."""
    if isinstance(style_1, (list, tuple)) and isinstance(style_2, (list, tuple)):
        n_pairs = len(style_1)
        groups, singles = {}, []
        for a, b in zip(style_1, style_2):
            nbytes = a.size * jnp.dtype(a.dtype).itemsize
            key = (tuple(a.shape), jnp.dtype(a.dtype).name, jnp.dtype(b.dtype).name)
            if nbytes <= _GROUP_BYTES_LIMIT:
                groups.setdefault(key, []).append((a, b))
            else:
                singles.append((a, b))
        loss = jnp.float32(0.0)
        for pairs in groups.values():
            if len(pairs) == 1:
                a, b = pairs[0]
            else:
                # Batch same-shaped small pairs into one pallas_call (review 7);
                # per-pair losses are additive, so summing over the stacked
                # batch equals the sum of per-pair losses.
                a = jnp.concatenate([p[0] for p in pairs], axis=0)
                b = jnp.concatenate([p[1] for p in pairs], axis=0)
            loss = loss + _cal_loss(a, b, compute_dtype)
        for a, b in singles:
            loss = loss + _cal_loss(a, b, compute_dtype)
        return loss / n_pairs
    return _cal_loss(style_1, style_2, compute_dtype)


def _style_loss_ref(s1, s2):
    """Pure-JAX reference mirroring the PyTorch code (for sanity checking)."""
    B, C = s1.shape[0], s1.shape[1]
    norm = jnp.sqrt(jnp.float32(np.prod(s1.shape[-3:])))
    f1 = jnp.reshape(s1, (B, C, -1)).astype(jnp.float32) / norm
    f2 = jnp.reshape(lax.stop_gradient(s2), (B, C, -1)).astype(jnp.float32) / norm
    g1 = jnp.einsum("bcn,bdn->bcd", f1, f1)
    g2 = jnp.einsum("bcn,bdn->bcd", f2, f2)
    return jnp.sum(jnp.square(g1 - g2)) / (4.0 * C)


if __name__ == "__main__":
    key = jax.random.PRNGKey(0)
    ks = jax.random.split(key, 8)

    # (a) even batch, N = 4*8*8 = 256 -> single full lane tile, no masking
    s1_a = jax.random.normal(ks[0], (2, 4, 4, 8, 8), dtype=jnp.float32)
    s2_a = jax.random.normal(ks[1], (2, 4, 4, 8, 8), dtype=jnp.float32)
    # (b) N = 3*5*7 = 105 (not a multiple of 128) -> gated partial-tail mask
    s1_b = jax.random.normal(ks[2], (2, 4, 3, 5, 7), dtype=jnp.float32)
    s2_b = jax.random.normal(ks[3], (2, 4, 3, 5, 7), dtype=jnp.float32)
    # (c) single-batch, N = 512, forced TN=128 -> 2-way split reduction (even KT)
    s1_c = jax.random.normal(ks[4], (1, 8, 4, 8, 16), dtype=jnp.float32)
    s2_c = jax.random.normal(ks[5], (1, 8, 4, 8, 16), dtype=jnp.float32)
    # (d) single-batch, N = 384, forced TN=128 -> split with odd KT (clamped
    #     index + fully-masked trailing step)
    s1_d = jax.random.normal(ks[6], (1, 8, 3, 8, 16), dtype=jnp.float32)
    s2_d = jax.random.normal(ks[7], (1, 8, 3, 8, 16), dtype=jnp.float32)

    # per-pair kernel vs. pure-JAX reference
    for s1, s2, tn in ((s1_a, s2_a, None), (s1_b, s2_b, None),
                       (s1_c, s2_c, 128), (s1_d, s2_d, 128)):
        got = jax.block_until_ready(_cal_loss(s1, s2, tile_n=tn))
        np.testing.assert_allclose(np.asarray(got),
                                   np.asarray(_style_loss_ref(s1, s2)),
                                   rtol=1e-5, atol=1e-5)

    # public single-pair path
    loss_single = jax.block_until_ready(style_loss(s1_a, s2_a))
    np.testing.assert_allclose(np.asarray(loss_single),
                               np.asarray(_style_loss_ref(s1_a, s2_a)),
                               rtol=1e-5, atol=1e-5)

    # list path: mean over pairs; the two same-shaped pairs share one pallas_call
    loss_list = jax.block_until_ready(
        style_loss([s1_a, s1_a * 0.5, s1_b], [s2_a, s2_a, s2_b]))
    ref_list = (_style_loss_ref(s1_a, s2_a) + _style_loss_ref(s1_a * 0.5, s2_a)
                + _style_loss_ref(s1_b, s2_b)) / 3.0
    np.testing.assert_allclose(np.asarray(loss_list), np.asarray(ref_list),
                               rtol=1e-5, atol=1e-5)

    # gradients (custom VJP; style_2 is detached)
    g_got = jax.block_until_ready(jax.grad(lambda a: style_loss(a, s2_a))(s1_a))
    g_ref = jax.grad(lambda a: _style_loss_ref(a, s2_a))(s1_a)
    np.testing.assert_allclose(np.asarray(g_got), np.asarray(g_ref),
                               rtol=1e-4, atol=1e-6)

    gl_got = jax.block_until_ready(
        jax.grad(lambda a: style_loss([a, s1_a * 2.0], [s2_a, s2_a]))(s1_a))
    gl_ref = jax.grad(
        lambda a: (_style_loss_ref(a, s2_a)
                   + _style_loss_ref(s1_a * 2.0, s2_a)) / 2.0)(s1_a)
    np.testing.assert_allclose(np.asarray(gl_got), np.asarray(gl_ref),
                               rtol=1e-4, atol=1e-6)

    # opt-in bf16 feed (halves HBM bytes); loose tolerance vs. the f32 module
    loss_bf16 = jax.block_until_ready(
        style_loss(s1_a, s2_a, compute_dtype=jnp.bfloat16))
    np.testing.assert_allclose(np.asarray(loss_bf16),
                               np.asarray(_style_loss_ref(s1_a, s2_a)),
                               rtol=1e-1, atol=1e-3)

    print("KERNEL_OK")
</pallas_src>

<mosaic_0001>
module attributes {stable_mosaic.version = 11 : i64} {
  func.func @_style_gram_kernel(%arg0: i32, %arg1: i32, %arg2: i32, %arg3: memref<1x4x256xf32, #tpu.memory_space<vmem>>, %arg4: memref<1x4x256xf32, #tpu.memory_space<vmem>>, %arg5: memref<1x1x4x4xf32, #tpu.memory_space<vmem>>) attributes {dimension_semantics = [#tpu.dimension_semantics<parallel>, #tpu.dimension_semantics<parallel>, #tpu.dimension_semantics<arbitrary>], iteration_bounds = array<i64: 2, 1, 1>, scalar_prefetch = 0 : i64, scratch_operands = 0 : i64, tpu.core_type = #tpu.core_type<tc>, window_params = [{transform_indices = @transform_0, window_bounds = array<i64: 1, 4, 256>}, {transform_indices = @transform_1, window_bounds = array<i64: 1, 4, 256>}, {transform_indices = @transform_2, window_bounds = array<i64: 1, 1, 4, 4>}]} {
    %c0_i32 = arith.constant 0 : i32
    %0 = arith.cmpi eq, %arg2, %c0_i32 : i32
    %1 = arith.extui %0 : i1 to i32
    %c0_i32_0 = arith.constant 0 : i32
    %2 = arith.cmpi ne, %1, %c0_i32_0 : i32
    scf.if %2 {
      %cst_15 = arith.constant 0.000000e+00 : f32
      %16 = vector.broadcast %cst_15 : f32 to vector<1x1x4x4xf32>
      %c0_16 = arith.constant 0 : index
      %c0_17 = arith.constant 0 : index
      %c0_18 = arith.constant 0 : index
      %c0_19 = arith.constant 0 : index
      %17 = vector.load %arg5[%c0_16, %c0_17, %c0_18, %c0_19] : memref<1x1x4x4xf32, #tpu.memory_space<vmem>>, vector<1x1x4x4xf32>
      tpu.vector_store %arg5[%c0_16, %c0_17, %c0_18, %c0_19], %16 {strides = array<i32>} : memref<1x1x4x4xf32, #tpu.memory_space<vmem>>, vector<1x1x4x4xf32>,
    } else {
    }
    %c0 = arith.constant 0 : index
    %c0_1 = arith.constant 0 : index
    %c0_2 = arith.constant 0 : index
    %3 = vector.load %arg3[%c0, %c0_1, %c0_2] : memref<1x4x256xf32, #tpu.memory_space<vmem>>, vector<1x4x256xf32>
    %4 = vector.shape_cast %3 : vector<1x4x256xf32> to vector<4x256xf32>
    %c0_3 = arith.constant 0 : index
    %c0_4 = arith.constant 0 : index
    %c0_5 = arith.constant 0 : index
    %5 = vector.load %arg4[%c0_3, %c0_4, %c0_5] : memref<1x4x256xf32, #tpu.memory_space<vmem>>, vector<1x4x256xf32>
    %6 = vector.shape_cast %5 : vector<1x4x256xf32> to vector<4x256xf32>
    %cst = arith.constant dense<0.000000e+00> : vector<4x4xf32>
    %7 = tpu.matmul %4, %4, %cst {dimension_numbers = #tpu.dot_dimension_numbers<[1], [1], [0], [0], [0, 0, 1, 0], [], []>} : vector<4x256xf32>, vector<4x256xf32>, vector<4x4xf32> -> vector<4x4xf32>
    %cst_6 = arith.constant dense<0.000000e+00> : vector<4x4xf32>
    %8 = tpu.matmul %6, %6, %cst_6 {dimension_numbers = #tpu.dot_dimension_numbers<[1], [1], [0], [0], [0, 0, 1, 0], [], []>} : vector<4x256xf32>, vector<4x256xf32>, vector<4x4xf32> -> vector<4x4xf32>
    %c0_7 = arith.constant 0 : index
    %c0_8 = arith.constant 0 : index
    %c0_9 = arith.constant 0 : index
    %c0_10 = arith.constant 0 : index
    %9 = vector.load %arg5[%c0_7, %c0_8, %c0_9, %c0_10] : memref<1x1x4x4xf32, #tpu.memory_space<vmem>>, vector<1x1x4x4xf32>
    %10 = vector.shape_cast %9 : vector<1x1x4x4xf32> to vector<4x4xf32>
    %11 = arith.subf %7, %8 : vector<4x4xf32>
    %12 = arith.addf %10, %11 : vector<4x4xf32>
    %c0_11 = arith.constant 0 : index
    %c0_12 = arith.constant 0 : index
    %c0_13 = arith.constant 0 : index
    %c0_14 = arith.constant 0 : index
    %13 = vector.load %arg5[%c0_11, %c0_12, %c0_13, %c0_14] : memref<1x1x4x4xf32, #tpu.memory_space<vmem>>, vector<1x1x4x4xf32>
    %14 = vector.shape_cast %13 : vector<1x1x4x4xf32> to vector<4x4xf32>
    %15 = vector.shape_cast %12 : vector<4x4xf32> to vector<1x1x4x4xf32>
    tpu.vector_store %arg5[%c0_11, %c0_12, %c0_13, %c0_14], %15 {strides = array<i32>} : memref<1x1x4x4xf32, #tpu.memory_space<vmem>>, vector<1x1x4x4xf32>,
    return
  }
  func.func @transform_0(%arg0: i32, %arg1: i32, %arg2: i32) -> (i32, i32, i32) {
    %c1_i32 = arith.constant 1 : i32
    %0 = arith.muli %arg1, %c1_i32 : i32
    %1 = arith.addi %0, %arg2 : i32
    %c0_i32 = arith.constant 0 : i32
    %2 = arith.minsi %1, %c0_i32 : i32
    %c0_i32_0 = arith.constant 0 : i32
    %c0_i32_1 = arith.constant 0 : i32
    return %arg0, %c0_i32_0, %2 : i32, i32, i32
  }
  func.func @transform_1(%arg0: i32, %arg1: i32, %arg2: i32) -> (i32, i32, i32) {
    %c1_i32 = arith.constant 1 : i32
    %0 = arith.muli %arg1, %c1_i32 : i32
    %1 = arith.addi %0, %arg2 : i32
    %c0_i32 = arith.constant 0 : i32
    %2 = arith.minsi %1, %c0_i32 : i32
    %c0_i32_0 = arith.constant 0 : i32
    %c0_i32_1 = arith.constant 0 : i32
    return %arg0, %c0_i32_0, %2 : i32, i32, i32
  }
  func.func @transform_2(%arg0: i32, %arg1: i32, %arg2: i32) -> (i32, i32, i32, i32) {
    %c0_i32 = arith.constant 0 : i32
    %c0_i32_0 = arith.constant 0 : i32
    %c0_i32_1 = arith.constant 0 : i32
    return %arg0, %arg1, %c0_i32, %c0_i32_0 : i32, i32, i32, i32
  }
}

</mosaic_0001>

<bundles_post_ra>
// kernel: tpu_custom_call.1
= control target key start
LH: loop header
LB: loop body
LE: loop exit
PB: predicated region body
PF: predicated region fallthrough
CT: control target
= control target key end

     0   :  { %7 = vsyncpa [#allocation3], 0  ;;  %s1016_s0 = inlined_call_operand.hbm [shape: f32[2,4,256], index: 0, kind: input, shape index: {}]   ;;  %s1017_s1 = inlined_call_operand.hbm [shape: f32[2,4,256], index: 1, kind: input, shape index: {}]   ;;  %s1018_s2 = inlined_call_operand.hbm [shape: f32[2,1,4,4], index: 2, kind: output, shape index: {}]  }
   0x1   :  { %9 = vsyncpa [#allocation3 + $0x1], 0 }
   0x2   :  { %10 = vsyncpa [#allocation6], 0 }
   0x3   :  { %12 = vsyncpa [#allocation6 + $0x1], 0 }
   0x4   :  { %13 = vsyncpa [#allocation4], 0 }
   0x5   :  { %15 = vsyncpa [#allocation4 + $0x1], 0  ;;  %s795_s9 = smov 0   ;;  %s797_s10 = smov 0  }
   0x6   :  { %s799_s11 = smov 0   ;;  %s801_s12 = smov 0  }
   0x7   :  { %s803_s13 = smov 0   ;;  %s805_s14 = smov 0  }
   0x8 LB: > { %s538_s15 = sadd.s32 4294967295, %s774_s14   ;;  %s539_s16 = sadd.s32 4294967294, %s774_s14   ;;  %s774_s14 = sphi %s805_s14, %s21_s14   ;;  %s770_s13 = sphi %s803_s13, %s1038_s13   ;;  %s766_s12 = sphi %s801_s12, %s1037_s12   ;;  %s762_s11 = sphi %s799_s11, %s1036_s11   ;;  %s758_s10 = sphi %s797_s10, %s1035_s10   ;;  %s754_s9 = sphi %s795_s9, %s1034_s9  }
   0x9   : > { %s40_s17 = sadd.s32 1, %s770_s13  ;;  %s55_s18 = sadd.s32 1, %s762_s11 }
   0xa   : > { %p42_p0 = scmp.ge.s32.totalorder %s40_s17, 2  ;;  %p62_p1 = scmp.ne.s32.totalorder %s762_s11, %s758_s10 }
   0xb   : > { %p63_p2 = scmp.eq.s32.totalorder %s774_s14, 0  ;;  %p68_p3 = scmp.ne.s32.totalorder %s758_s10, %s754_s9 }
   0xc   : > { %s1040_s17 = smov (%p42_p0, %s40_s17), 0  ;;  %p69_p5 = scmp.eq.s32.totalorder %s538_s15, 0 }
   0xd   : > { %p836_p4 = por %p63_p2, %p62_p1  ;;  %s50_s20 = ssub.s32 %s770_s13, %s1040_s17 }
   0xe   : > { %p128_p6 = scmp.eq.s32.totalorder %s538_s15, 1  ;;  %p53_p7 = scmp.eq.s32.totalorder %s50_s20, 0 }
   0xf   : > { %p842_p8 = por %p69_p5, %p68_p3  ;;  %p134_p10 = scmp.eq.s32.totalorder %s539_s16, 1 }
  0x10   : > { %p846_p9 = por %p128_p6, %p62_p1  ;;  %p575_p13 = scmp.lt.s32.totalorder %s774_s14, 2 }
  0x11   : > { %s1022_s21 = scalar_select %p842_p8, 1, 0 }
  0x12   : > { %s1023_s22 = scalar_select %p846_p9, 1, 0 }
  0x13   : > { %s851_s23 = scalar_select %p53_p7, %s762_s11, %s55_s18  }
  0x14   : > { %p853_p11 = por %p134_p10, %p68_p3  ;;  %s860_s25 = sand.u32 1, %s762_s11  }
  0x15   : > { %s542_s26 = sshll.u32 %s860_s25, 3  ;;  %s556_s27 = sshll.u32 %s770_s13, 7 }
  0x16   : > { %s1024_s24 = scalar_select %p853_p11, 1, 0 }
  0x17   : > { %s869_s30 = scalar_lea.hbm %s1016_s0, %s556_s27  ;;  %s158_s3 = scalar_lea.vmem [#allocation2], %s542_s26 }
  0x18   : > { %s171_s4 = sshll.u32 %s158_s3, 4  ;;  %p877_p0 = pnand %p575_p13, %p836_p4  ;;  %s873_s4 = int_to_ptr.vmem [resolvable:$true] %s171_s4 }
  0x19   : > { %s155_s6 = scalar_lea.sflag [#allocation3], %s860_s25  ;;  %s628_s7 = scalar_lea.hbm %s869_s30, 128 }
  0x1a   : > { %p629_p3 = scmp.ne.s32.totalorder %s869_s30, %s628_s7  ;;  %p630_p5 = pneg %p877_p0 }
  0x1b   : > { %s633_s16 = scalar_lea.hbm %s1016_s0, 256  ;;  %p634_p4 = scmp.lt.u32.totalorder %s869_s30, %s1016_s0 }
  0x1c   : > { %p631_p6 = pnand %p630_p5, %p629_p3  ;;  %p635_p10 = scmp.lt.u32.totalorder %s633_s16, %s628_s7 }
  0x1d   : > { %p637_p12 = scmp.lt.u32.totalorder %s628_s7, %s869_s30 }
  0x1e   : > { %p632_p7 = pneg %p631_p6  ;;  %p636_p13 = por %p635_p10, %p634_p4 }
  0x20   : > { %p638_p1 = por %p637_p12, %p636_p13 }
  0x22   : > { %p639_p2 = pnand %p638_p1, %p632_p7 }
  0x24   : > { %642 = shalt.err (!%p639_p2)
}
  0x25   : > { %s643_s20 = scalar_lea.vmem %s873_s4, 128  ;;  %s776_s28 = smov [#allocation2]  }
  0x26   : > { %p644_p3 = scmp.ne.s32.totalorder %s873_s4, %s643_s20  ;;  %s648_s29 = sshll.u32 %s776_s28, 4  ;;  %s649_s29 = int_to_ptr.vmem [resolvable:$false] %s648_s29 }
  0x27   : > { %s650_s3 = scalar_lea.vmem %s649_s29, 256  ;;  %p651_p9 = scmp.lt.s32.totalorder %s873_s4, %s649_s29 }
  0x28   : > { %p646_p6 = pnand %p644_p3, %p630_p5  ;;  %p652_p4 = scmp.lt.s32.totalorder %s650_s3, %s643_s20 }
  0x2a   : > { %p647_p11 = pneg %p646_p6  ;;  %p653_p10 = por %p652_p4, %p651_p9 }
  0x2c   : > { %p654_p12 = pnand %p653_p10, %p647_p11 }
  0x2e   : > { %657 = shalt.err (!%p654_p12)
}
  0x2f   : > { %567 = dma.hbm_to_vmem [thread:$0]  (!%p877_p0), %s869_s30, 128, %s873_s4, %s155_s6  }
  0x30   : > { %p1026_p1 = scmp.lt.s32.totalorder %s774_s14, 3  ;;  %p1027_p2 = scmp.ge.s32.totalorder %s774_s14, 1 }
  0x31   : > { %s922_s16 = scalar_lea.hbm %s1017_s1, %s556_s27  ;;  %s182_s18 = scalar_lea.vmem [#allocation5], %s542_s26 }
  0x32   : > { %p913_p7 = pnand %p1027_p2, %p1026_p1  ;;  %s195_s19 = sshll.u32 %s182_s18, 4  ;;  %s196_s19 = int_to_ptr.vmem [resolvable:$true] %s195_s19 }
  0x33   : > { %s179_s30 = scalar_lea.sflag [#allocation6], %s860_s25  ;;  %s658_s4 = scalar_lea.hbm %s922_s16, 128 }
  0x34   : > { %s1028_s7 = scalar_select %p913_p7, 1, 0 }
  0x35   : > { %p659_p9 = scmp.ne.s32.totalorder %s922_s16, %s658_s4  ;;  %s663_s27 = scalar_lea.hbm %s1017_s1, 256 }
  0x36   : > { %p664_p3 = scmp.lt.u32.totalorder %s922_s16, %s1017_s1  ;;  %p665_p6 = scmp.lt.u32.totalorder %s663_s27, %s658_s4 }
  0x37   : > { %p661_p11 = pnand %p659_p9, %p630_p5  ;;  %p667_p10 = scmp.lt.u32.totalorder %s658_s4, %s922_s16 }
  0x38   : > { %p666_p4 = por %p665_p6, %p664_p3 }
  0x39   : > { %p662_p13 = pneg %p661_p11 }
  0x3a   : > { %p668_p12 = por %p667_p10, %p666_p4 }
  0x3c   : > { %p669_p1 = pnand %p668_p12, %p662_p13 }
  0x3e   : > { %672 = shalt.err (!%p669_p1)
}
  0x3f   : > { %s673_s25 = scalar_lea.vmem %s196_s19, 128  ;;  %s777_s26 = smov [#allocation5]  }
  0x40   : > { %p674_p2 = scmp.ne.s32.totalorder %s196_s19, %s673_s25  ;;  %s678_s3 = sshll.u32 %s777_s26, 4  ;;  %s679_s3 = int_to_ptr.vmem [resolvable:$false] %s678_s3 }
  0x41   : > { %s680_s8 = scalar_lea.vmem %s679_s3, 256  ;;  %p681_p8 = scmp.lt.s32.totalorder %s196_s19, %s679_s3 }
  0x42   : > { %p676_p9 = pnand %p674_p2, %p630_p5  ;;  %p682_p7 = scmp.lt.s32.totalorder %s680_s8, %s673_s25 }
  0x44   : > { %p677_p11 = pneg %p676_p9  ;;  %p683_p3 = por %p682_p7, %p681_p8 }
  0x46   : > { %p684_p6 = pnand %p683_p3, %p677_p11 }
  0x48   : > { %687 = shalt.err (!%p684_p6)
}
  0x49   : > { %570 = dma.hbm_to_vmem [thread:$0]  (!%p877_p0), %s922_s16, 128, %s196_s19, %s179_s30  }
  0x4a   : > { %p1029_p13 = scmp.ne.s32.totalorder %s1028_s7, 0 }
  0x4b   : > { %s949_s15 = sand.u32 (!%p1029_p13), 1, %s758_s10   ;;  %p1030_p5 = scmp.ne.s32.totalorder (!%p1029_p13), %s1022_s21, 0 }
  0x4c   : > { %204 = sbr.rel (%p1029_p13) target bundleno = 323 (0x143), region = 28  ;;  %s549_s18 = sshll.u32 (!%p1029_p13), %s949_s15, 3 }
  0x4d   : > { %s207_s4 = scalar_lea.sflag (!%p1029_p13), [#allocation3], %s949_s15  ;;  %s210_s6 = scalar_lea.vmem (!%p1029_p13), [#allocation2], %s549_s18 }
  0x53   : > { %741 = dma.done.wait (%p1030_p5), %s207_s4, 128  }
  0x54   : > { %743 = vsyncadd (%p1030_p5), %s207_s4, 4294967168  ;;  %s216_s5 = scalar_lea.sflag [#allocation6], %s949_s15  ;;  %s219_s16 = scalar_lea.vmem [#allocation5], %s549_s18 }
  0x55   : > { %745 = dma.done.wait (%p1030_p5), %s216_s5, 128  }
  0x56   : > { %747 = vsyncadd (%p1030_p5), %s216_s5, 4294967168  ;;  %v259_v0 = vld [vmem:[%s210_s6] sm:$0xff]  ;;  %v260_v1 = vld [vmem:[%s219_s16] sm:$0xff]  ;;  %s551_s7 = sshll.u32 %s949_s15, 2  ;;  %vm257_vm0 = vcmask 27648   ;;  %v778_v4 = vmov 0.0  }
  0x57   : > { %v262_v2 = vcombine.high %v259_v0, %v259_v0  ;;  %v335_v3 = vcombine.high %v260_v1, %v260_v1  ;;  %s244_s19 = scalar_lea.vmem [#allocation7], %s551_s7  ;;  %s553_s21 = sshll.u32 %s766_s12, 6 }
  0x58   : > { %258 = vst.msk [vmem:[%s244_s19] sm:$0xf] %vm257_vm0, %v778_v4  ;;  %s427_s30 = sshll.u32 %s244_s19, 4  ;;  %s967_s28 = scalar_lea.hbm %s1018_s2, %s553_s21  ;;  %s969_s30 = int_to_ptr.vmem [resolvable:$true] %s427_s30 }
  0x59   : > { %264 = vmatprep.subr.mxu0 %v262_v2  ;;  %337 = vmatprep.subr.mxu1 %v335_v3  ;;  %s413_s29 = scalar_lea.sflag [#allocation4], %s949_s15  ;;  %s688_s25 = scalar_lea.vmem %s969_s30, 64 }
  0x5a   : > { %265 = vmatpush1.xpose.msra.mxu0 %v259_v0  ;;  %338 = vmatpush1.xpose.msra.mxu1 %v260_v1  ;;  %p689_p8 = scmp.ne.s32.totalorder %s969_s30, %s688_s25  ;;  %p1031_p0 = scmp.ne.s32.totalorder %s1023_s22, 0 }
  0x5b   : > { %328 = vmatprep.mubr.f32.mxu0 %v262_v2  ;;  %401 = vmatprep.mubr.f32.mxu1 %v335_v3  ;;  %s779_s12 = smov [#allocation7]  }
  0x5c   : > { %p690_p7 = pnand %p689_p8, %p1031_p0  ;;  %s692_s26 = sshll.u32 %s779_s12, 4  ;;  %s693_s26 = int_to_ptr.vmem [resolvable:$false] %s692_s26 }
  0x5d   : > { %329 = vmatmul.mubr.f32.vlgmr.msra.gmra.mrb[0].mxu0 %v259_v0  ;;  %402 = vmatmul.mubr.f32.vlgmr.msra.gmra.mrb[0].mxu1 %v260_v1  ;;  %s694_s3 = scalar_lea.vmem %s693_s26, 128  ;;  %p695_p10 = scmp.lt.s32.totalorder %s969_s30, %s693_s26 }
  0x5e   : > { %p691_p4 = pneg %p690_p7  ;;  %p696_p12 = scmp.lt.s32.totalorder %s694_s3, %s688_s25 }
  0x5f   : > { %v407_v7 = vld [vmem:[%s244_s19] sm:$0xf] }
  0x60   : > { %p697_p1 = por %p696_p12, %p695_p10 }
  0x62   : > { %p698_p2 = pnand %p697_p1, %p691_p4 }
 0x130   : > { %v330_v5 = vpop.f32.mrb[0].mxu0  ;;  %v403_v6 = vpop.f32.mrb[0].mxu1 }
 0x131   : > { %v408_v8 = vsub.f32 %v330_v5, %v403_v6  ;;  %v332_v9 = vpop.f32.mrb[1].mxu0  ;;  %v405_v10 = vpop.f32.mrb[1].mxu1 }
 0x133   : > { %v409_v11 = vadd.f32 %v408_v8, %v407_v7 }
 0x135   : > { %411 = vst.msk [vmem:[%s244_s19] sm:$0xf] %vm257_vm0, %v409_v11 }
 0x136   : > { %701 = shalt.err (!%p698_p2)
}
 0x137   : > { %s702_s8 = scalar_lea.hbm %s967_s28, 64  ;;  %s706_s4 = scalar_lea.hbm %s1018_s2, 128 }
 0x138   : > { %p703_p9 = scmp.ne.s32.totalorder %s967_s28, %s702_s8  ;;  %p707_p6 = scmp.lt.u32.totalorder %s967_s28, %s1018_s2 }
 0x139   : > { %p708_p13 = scmp.lt.u32.totalorder %s706_s4, %s702_s8  ;;  %p710_p8 = scmp.lt.u32.totalorder %s702_s8, %s967_s28 }
 0x13a   : > { %p704_p11 = pnand %p703_p9, %p1031_p0 }
 0x13b   : > { %p709_p5 = por %p708_p13, %p707_p6 }
 0x13c   : > { %p705_p3 = pneg %p704_p11 }
 0x13d   : > { %p711_p7 = por %p710_p8, %p709_p5 }
 0x13f   : > { %p712_p4 = pnand %p711_p7, %p705_p3 }
 0x141   : > { %715 = shalt.err (!%p712_p4)
}
 0x142   : > { %562 = dma.vmem_to_hbm [thread:$0]  (%p1031_p0), %s969_s30, 64, %s967_s28, %s413_s29  }
 0x143 PF: > { %s439_s16 = sand.u32 1, %s754_s9   ;;  %p1032_p10 = scmp.ne.s32.totalorder %s1024_s24, 0 }
 0x144   : > { %p1033_p12 = scmp.ge.s32.totalorder %s774_s14, 2  ;;  %s440_s7 = scalar_lea.sflag [#allocation4], %s439_s16 }
 0x146   : > { %p572_p1 = pnand %p1033_p12, %p1032_p10 }
 0x148   : > { %749 = dma.done.wait (!%p572_p1), %s440_s7, 64  }
 0x149   : > { %751 = vsyncadd (!%p572_p1), %s440_s7, 4294967232  ;;  %s21_s14 = sadd.s32 1, %s774_s14   ;;  %s1034_s9 = smov %s758_s10 }
 0x14a   : > { %p18_p2 = scmp.ge.s32.totalorder %s21_s14, 4   ;;  %s1035_s10 = smov %s762_s11 }
 0x14b   : > { %s1036_s11 = smov %s851_s23  ;;  %s1037_s12 = smov %s770_s13 }
 0x14c   : > { %s1038_s13 = smov %s1040_s17  ;;  %20 = sbr.rel (!%p18_p2) target bundleno = 8 (0x8), region = 90 }
 0x153   :  { %445 = vsyncpa [#allocation3], 1 }
 0x154   :  { %447 = vsyncpa [#allocation3 + $0x1], 1 }
 0x155   :  { %448 = vsyncpa [#allocation6], 1 }
 0x156   :  { %450 = vsyncpa [#allocation6 + $0x1], 1 }
 0x157   :  { %451 = vsyncpa [#allocation4], 1 }
 0x158   :  { %453 = vsyncpa [#allocation4 + $0x1], 1 }

</bundles_post_ra>
